<compile_context>
chip_gen: v6e
topology: v6e:2x2x1
jax: 0.10.0
libtpu: 0.0.40
codegen_flags: <defaults>
</compile_context>

<pallas_src>
import functools

import jax
import jax.numpy as jnp
from jax.experimental import pallas as pl
from jax.experimental.pallas import tpu as pltpu


def _preemphasis_kernel(x_ref, o_ref, *, coef):
    x = x_ref[...]                                    # (rows, T) tile in VMEM
    # prev[:, 0] = x[:, 1]   (reflect-pad boundary)
    # prev[:, t] = x[:, t-1] (t >= 1) — single static lane shift, no iota/select.
    prev = jnp.concatenate([x[:, 1:2], x[:, :-1]], axis=1)
    o_ref[...] = x - coef * prev                      # one lane-dense full store


def _choose_block_rows(batch: int, seq: int, itemsize: int) -> int:
    # ~2 MiB per tile buffer; with double-buffered input + output that is
    # <= ~8 MiB live VMEM — inside every generation's default scoped limit.
    budget_bytes = 2 * 1024 * 1024
    rows = budget_bytes // max(1, seq * itemsize)
    if batch <= 8 or rows >= batch:
        return batch                          # single tile along rows is legal
    rows = max(8, (rows // 8) * 8)            # keep sublane dim a multiple of 8
    return min(rows, batch)


def pre_emphasis(x: jax.Array, coef: float = 0.97, *,
                 block_rows: int | None = None) -> jax.Array:
    """x: (B, 1, T) -> (B, 1, T); y[t] = x[t] - coef * x[t-1] with reflect pad."""
    assert x.ndim == 3, "The number of dimensions of input tensor must be 3!"
    B, C, T = x.shape
    assert C == 1, "conv1d filter has in_channels=1 (single channel)"
    assert T >= 2, "reflect pad of width 1 requires at least 2 samples"

    x2d = x.reshape(B, T)                     # channel squeezed; T on lane axis
    tb = block_rows if block_rows is not None else _choose_block_rows(
        B, T, x.dtype.itemsize)
    tb = min(tb, B)
    grid = (pl.cdiv(B, tb),)

    # NOTE: coef is a static closure constant (fixed hyperparameter at module
    # init); a different coef triggers a recompile, which is acceptable here.
    # TODO(synk): for extremely long T (a single 8-row tile exceeding a few MiB)
    # tile T with a 1-sample halo; not needed for typical audio lengths.
    out = pl.pallas_call(
        functools.partial(_preemphasis_kernel, coef=coef),
        out_shape=jax.ShapeDtypeStruct((B, T), x.dtype),
        grid=grid,
        in_specs=[pl.BlockSpec((tb, T), lambda i: (i, 0))],
        out_specs=pl.BlockSpec((tb, T), lambda i: (i, 0)),
        compiler_params=pltpu.CompilerParams(
            dimension_semantics=("parallel",),
            vmem_limit_bytes=32 * 1024 * 1024,
        ),
    )(x2d)
    return out.reshape(B, 1, T)


def _reference(x: jax.Array, coef: float = 0.97) -> jax.Array:
    # Pure-JAX reference: reflect pad + 2-tap conv [-coef, 1.0].
    xp = jnp.pad(x, ((0, 0), (0, 0), (1, 0)), mode="reflect")
    return xp[..., 1:] - coef * xp[..., :-1]


if __name__ == "__main__":
    coef = 0.97
    key = jax.random.PRNGKey(0)
    k1, k2 = jax.random.split(key)

    # Small shape matching the module's (B, 1, T) contract — single-tile path.
    B, C, T = 2, 1, 512
    x = jax.random.normal(k1, (B, C, T), dtype=jnp.float32)
    y = jax.block_until_ready(pre_emphasis(x, coef))
    assert y.shape == (B, C, T)
    assert jnp.allclose(y, _reference(x, coef), atol=1e-6, rtol=1e-6), \
        "mismatch vs reference (single tile)"

    # Exercise the multi-step grid / pipelined path (rows split across blocks).
    B2, T2 = 16, 256
    x2 = jax.random.normal(k2, (B2, 1, T2), dtype=jnp.float32)
    y2 = jax.block_until_ready(pre_emphasis(x2, coef, block_rows=8))
    assert y2.shape == (B2, 1, T2)
    assert jnp.allclose(y2, _reference(x2, coef), atol=1e-6, rtol=1e-6), \
        "mismatch vs reference (tiled grid)"

    print("KERNEL_OK")
</pallas_src>

<mosaic_0001>
module attributes {stable_mosaic.version = 11 : i64} {
  func.func @_preemphasis_kernel(%arg0: i32, %arg1: memref<2x512xf32, #tpu.memory_space<vmem>>, %arg2: memref<2x512xf32, #tpu.memory_space<vmem>>) attributes {dimension_semantics = [#tpu.dimension_semantics<parallel>], iteration_bounds = array<i64: 1>, scalar_prefetch = 0 : i64, scratch_operands = 0 : i64, tpu.core_type = #tpu.core_type<tc>, window_params = [{transform_indices = @transform_0, window_bounds = array<i64: 2, 512>}, {transform_indices = @transform_1, window_bounds = array<i64: 2, 512>}]} {
    %c0 = arith.constant 0 : index
    %c0_0 = arith.constant 0 : index
    %0 = vector.load %arg1[%c0, %c0_0] : memref<2x512xf32, #tpu.memory_space<vmem>>, vector<2x512xf32>
    %1 = vector.extract_strided_slice %0 {offsets = [0, 1], sizes = [2, 1], strides = [1, 1]} : vector<2x512xf32> to vector<2x1xf32>
    %2 = vector.extract_strided_slice %0 {offsets = [0, 0], sizes = [2, 511], strides = [1, 1]} : vector<2x512xf32> to vector<2x511xf32>
    %3 = tpu.concatenate %1, %2 in 1 : vector<2x1xf32>, vector<2x511xf32> -> vector<2x512xf32>
    %cst = arith.constant 9.700000e-01 : f32
    %4 = vector.broadcast %cst : f32 to vector<2x512xf32>
    %5 = arith.mulf %4, %3 : vector<2x512xf32>
    %6 = arith.subf %0, %5 : vector<2x512xf32>
    %c0_1 = arith.constant 0 : index
    %c0_2 = arith.constant 0 : index
    %7 = vector.load %arg2[%c0_1, %c0_2] : memref<2x512xf32, #tpu.memory_space<vmem>>, vector<2x512xf32>
    tpu.vector_store %arg2[%c0_1, %c0_2], %6 {strides = array<i32>} : memref<2x512xf32, #tpu.memory_space<vmem>>, vector<2x512xf32>,
    return
  }
  func.func @transform_0(%arg0: i32) -> (i32, i32) {
    %c0_i32 = arith.constant 0 : i32
    %c0_i32_0 = arith.constant 0 : i32
    return %arg0, %c0_i32 : i32, i32
  }
  func.func @transform_1(%arg0: i32) -> (i32, i32) {
    %c0_i32 = arith.constant 0 : i32
    %c0_i32_0 = arith.constant 0 : i32
    return %arg0, %c0_i32 : i32, i32
  }
}

</mosaic_0001>

<bundles_post_ra>
// kernel: tpu_custom_call.1
= control target key start
LH: loop header
LB: loop body
LE: loop exit
PB: predicated region body
PF: predicated region fallthrough
CT: control target
= control target key end

     0   :  { %6 = vsyncpa [#allocation3], 0  ;;  %s174_s0 = inlined_call_operand.hbm [shape: f32[2,512], index: 0, kind: input, shape index: {}]   ;;  %s175_s1 = inlined_call_operand.hbm [shape: f32[2,512], index: 1, kind: output, shape index: {}]  }
   0x1   :  { %7 = vsyncpa [#allocation4], 0  ;;  %s153_s6 = smov [#allocation2]  }
   0x2   :  { %s14_s7 = sshll.u32 %s153_s6, 4  ;;  %s15_s7 = int_to_ptr.vmem [resolvable:$true] %s14_s7 }
   0x3   :  { %s117_s8 = scalar_lea.vmem %s15_s7, 128  ;;  %p122_p1 = scmp.lt.s32.totalorder %s15_s7, %s15_s7 }
   0x4   :  { %p118_p0 = scmp.ne.s32.totalorder %s15_s7, %s117_s8  ;;  %p123_p2 = scmp.lt.s32.totalorder %s117_s8, %s117_s8 }
   0x6   :  { %p124_p3 = por %p123_p2, %p122_p1 }
   0x8   :  { %p125_p4 = pnand %p124_p3, %p118_p0 }
   0xa   :  { %128 = shalt.err (!%p125_p4)
}
   0xb   :  { %17 = dma.hbm_to_vmem [thread:$0]  %s174_s0, 128, %s15_s7, [#allocation3]  }
   0xc   :  { %149 = dma.done.wait [#allocation3], 128  }
   0xd   :  { %150 = vsyncadd [#allocation3], 4294967168  ;;  %v26_v0 = vlaneseq  ;;  %v154_v1 = vmov 1983009808   ;;  %v21_v6 = vld [vmem:[#allocation2] sm:$0xff]  ;;  %s155_s11 = smov 127  }
   0xe   :  { %v24_v2 = vunpack.c.l.s4 %v154_v1  ;;  %v33_v8 = vcombine.high %v21_v6, %v21_v6  ;;  %s156_s12 = smov 1   ;;  %vm51_vm0 = vcmask 7168   ;;  %s157_s0 = smov [#allocation5]  }
   0xf   :  { %v27_v3 = vshrl.u32 %v26_v0, 7  ;;  %s94_s13 = sshll.u32 %s157_s0, 4  ;;  %s95_s13 = int_to_ptr.vmem [resolvable:$true] %s94_s13 }
  0x10   :  { %v25_v4 = vunpack.c.0.s8 %v24_v2  ;;  %s129_s14 = scalar_lea.vmem %s95_s13, 128  ;;  %p134_p6 = scmp.lt.s32.totalorder %s95_s13, %s95_s13 }
  0x11   :  { %p130_p5 = scmp.ne.s32.totalorder %s95_s13, %s129_s14  ;;  %p135_p7 = scmp.lt.s32.totalorder %s129_s14, %s129_s14 }
  0x12   :  { %v28_v5 = vsub.s32 %v25_v4, %v27_v3 }
  0x13   :  { %p136_p8 = por %p135_p7, %p134_p6 }
  0x14   :  { %v29_v7 = vrot.slane %v21_v6, %v28_v5  ;;  %v40_v10 = vrot.slane %v33_v8, %v28_v5 }
  0x15   :  { %p137_p9 = pnand %p136_p8, %p130_p5 }
  0x16   :  { %30 = vrot.lane.b32.xlu0 %v29_v7, %s155_s11  ;;  %v41_v9 = vcombine.high %v29_v7, %v29_v7  ;;  %v42_v11 = vcombine.high %v40_v10, %v40_v10 }
  0x18   :  { %45 = vrot.lane.b32.xlu1 %v41_v9, %s156_s12 }
  0x1a   :  { %43 = vrot.lane.b32.xlu0 %v29_v7, %s156_s12 }
  0x1c   :  { %47 = vrot.lane.b32.xlu1 %v40_v10, %s156_s12 }
  0x1e   :  { %49 = vrot.lane.b32.xlu0 %v42_v11, %s156_s12 }
  0x88   :  { %v31_v12 = vpop.permute.xlu0 %30 }
  0x8a   :  { %v46_v13 = vpop.permute.xlu1 %45 }
  0x8c   :  { %v44_v14 = vpop.permute.xlu0 %43 }
  0x8d   :  { %v52_v15 = vsel %vm51_vm0, %v44_v14, %v46_v13  ;;  %v59_v16 = vsel %vm51_vm0, %v31_v12, %v44_v14 }
  0x8e   :  { %v60_v17 = vmul.f32 0.97, %v59_v16  ;;  %v61_v18 = vmul.f32 0.97, %v52_v15  ;;  %v48_v19 = vpop.permute.xlu1 %47 }
  0x8f   :  { %v53_v20 = vsel %vm51_vm0, %v46_v13, %v48_v19 }
  0x90   :  { %v50_v21 = vpop.permute.xlu0 %49  ;;  %v68_v23 = vcombine.low %v60_v17, %v61_v18  ;;  %v62_v24 = vmul.f32 0.97, %v53_v20 }
  0x91   :  { %v54_v22 = vsel %vm51_vm0, %v48_v19, %v50_v21 }
  0x92   :  { %v63_v25 = vmul.f32 0.97, %v54_v22  ;;  %v76_v27 = vrot.slane %v68_v23, %v28_v5 }
  0x94   :  { %v69_v26 = vcombine.low %v62_v24, %v63_v25 }
  0x96   :  { %v83_v28 = vrot.slane %v69_v26, %v28_v5 }
  0x98   :  { %v84_v29 = vcombine.low %v76_v27, %v83_v28 }
  0x9a   :  { %v86_v30 = vsub.f32 %v21_v6, %v84_v29 }
  0x9c   :  { %87 = vst [vmem:[#allocation5] sm:$0xff] %v86_v30 }
  0x9d   :  { %140 = shalt.err (!%p137_p9)
}
  0x9e   :  { %97 = dma.vmem_to_hbm [thread:$0]  %s95_s13, 128, %s175_s1, [#allocation4]  }
  0x9f   :  { %151 = dma.done.wait [#allocation4], 128  }
  0xa0   :  { %152 = vsyncadd [#allocation4], 4294967168 }
  0xa1   :  { %101 = vsyncpa [#allocation3], 1 }
  0xa2   :  { %102 = vsyncpa [#allocation4], 1 }

</bundles_post_ra>
